<compile_context>
chip_gen: v7x
topology: tpu7x:2x2x1
jax: 0.10.0
libtpu: 0.0.40
codegen_flags: <defaults>
</compile_context>

<pallas_src>
import functools

import jax
import jax.numpy as jnp
from jax.experimental import pallas as pl
from jax.experimental.pallas import tpu as pltpu

LANES = 128


def _neg_bce_terms(p, t):
    """-(per-element BCE) in f32, with PyTorch's log clamp at -100."""
    p = p.astype(jnp.float32)
    t = t.astype(jnp.float32)
    log_p = jnp.maximum(jnp.log(p), -100.0)
    log_1mp = jnp.maximum(jnp.log(1.0 - p), -100.0)
    # -(t*log p + (1-t)*log(1-p)) == -(log(1-p) + t*(log p - log(1-p)))
    return log_1mp + t * (log_p - log_1mp)


def _bce_sum_kernel(p_ref, t_ref, out_ref, acc_ref, *, rows, block_rows,
                    blocks_per_core, total_blocks, ragged):
    c = pl.program_id(0)   # core-split axis ("parallel")
    k = pl.program_id(1)   # streaming axis ("arbitrary")

    @pl.when(k == 0)
    def _init():
        acc_ref[...] = jnp.zeros_like(acc_ref)

    lb = c * blocks_per_core + k          # linear row-block id
    sub = block_rows // 8
    full_blocks = total_blocks - 1 if ragged else total_blocks

    # Steady state: full blocks, no mask, accumulate into an (8, 128) slab.
    @pl.when(lb < full_blocks)
    def _steady():
        v = _neg_bce_terms(p_ref[...], t_ref[...])
        acc_ref[...] += v.reshape(sub, 8, LANES).sum(axis=0)

    if ragged:
        # Final (partial) block only: rows past `rows` hold unspecified data
        # (log of garbage may be NaN), so SELECT them to zero (not multiply).
        @pl.when(lb == total_blocks - 1)
        def _tail():
            v = _neg_bce_terms(p_ref[...], t_ref[...])
            row_ids = lb * block_rows + jax.lax.broadcasted_iota(
                jnp.int32, (block_rows, LANES), 0)
            v = jnp.where(row_ids < rows, v, 0.0)
            acc_ref[...] += v.reshape(sub, 8, LANES).sum(axis=0)

    @pl.when(k == pl.num_programs(1) - 1)
    def _finalize():
        out_ref[...] = acc_ref[...]   # wrapper does the final (tiny) reduce


def _default_num_cores():
    # 2 TensorCores per chip only on v7x-class devices; 1 elsewhere.
    try:
        kind = jax.devices()[0].device_kind.lower()
    except Exception:
        return 1
    return 2 if "7" in kind else 1


@functools.partial(jax.jit, static_argnums=(2, 3))
def _multi_bce_loss_impl(inp, target, block_rows, num_cores):
    n = inp.size
    flat_p = inp.reshape(-1)
    flat_t = target.reshape(-1)

    rows = n // LANES
    n_main = rows * LANES

    neg_sum = jnp.float32(0.0)

    if rows > 0:
        # 128-aligned prefix as a lane-dense [rows, 128] slab (pure reshape
        # when n is already a multiple of 128 — the common case).
        p2d = flat_p[:n_main].reshape(rows, LANES)
        t2d = flat_t[:n_main].reshape(rows, LANES)

        # Row-block size: multiple of 32 (covers f32/bf16/fp8 sublane tiling),
        # no larger than needed for small inputs.
        br = min(int(block_rows), -(-rows // 32) * 32)
        br = max(32, (br // 32) * 32)
        total_blocks = -(-rows // br)
        ragged = (rows % br) != 0
        num_cores_eff = max(1, min(int(num_cores), total_blocks))
        blocks_per_core = -(-total_blocks // num_cores_eff)
        grid = (num_cores_eff, blocks_per_core)

        kernel = functools.partial(
            _bce_sum_kernel, rows=rows, block_rows=br,
            blocks_per_core=blocks_per_core, total_blocks=total_blocks,
            ragged=ragged)

        def in_map(c, k):
            return (jnp.minimum(c * blocks_per_core + k, total_blocks - 1), 0)

        bytes_accessed = (p2d.size * p2d.dtype.itemsize
                          + t2d.size * t2d.dtype.itemsize
                          + num_cores_eff * 8 * LANES * 4)

        partial_slabs = pl.pallas_call(
            kernel,
            out_shape=jax.ShapeDtypeStruct((num_cores_eff * 8, LANES),
                                           jnp.float32),
            grid_spec=pltpu.PrefetchScalarGridSpec(
                num_scalar_prefetch=0,
                grid=grid,
                in_specs=[
                    pl.BlockSpec((br, LANES), in_map),
                    pl.BlockSpec((br, LANES), in_map),
                ],
                out_specs=pl.BlockSpec((8, LANES), lambda c, k: (c, 0)),
                scratch_shapes=[pltpu.VMEM((8, LANES), jnp.float32)],
            ),
            compiler_params=pltpu.CompilerParams(
                dimension_semantics=("parallel", "arbitrary"),
                vmem_limit_bytes=32 * 1024 * 1024,
            ),
            cost_estimate=pl.CostEstimate(
                flops=5 * n_main,
                transcendentals=2 * n_main,
                bytes_accessed=bytes_accessed),
        )(p2d, t2d)

        neg_sum = neg_sum + jnp.sum(partial_slabs)

    if n_main < n:
        # <128-element tail handled with plain jnp (no pad/copy of the stream).
        neg_sum = neg_sum + jnp.sum(
            _neg_bce_terms(flat_p[n_main:], flat_t[n_main:]))

    return -neg_sum / jnp.float32(n)


def multi_bce_loss(inp, target, block_rows=4096, num_cores=None):
    """nn.BCELoss()(input.reshape(-1), target.reshape(-1)), mean reduction."""
    if num_cores is None:
        num_cores = _default_num_cores()
    return _multi_bce_loss_impl(inp, target, int(block_rows), int(num_cores))


def _reference(inp, target):
    return jnp.mean(-_neg_bce_terms(inp.reshape(-1), target.reshape(-1)))


if __name__ == "__main__":
    key = jax.random.PRNGKey(0)
    k1, k2 = jax.random.split(key)

    # NCHW-shaped inputs, as BCELoss would receive post-sigmoid probabilities.
    x_shape = (2, 4, 16, 16)
    inp = jax.nn.sigmoid(jax.random.normal(k1, x_shape, dtype=jnp.float32))
    target = (jax.random.uniform(k2, x_shape) > 0.5).astype(jnp.float32)

    out = multi_bce_loss(inp, target)
    out = jax.block_until_ready(out)

    ref = _reference(inp, target)
    assert jnp.allclose(out, ref, rtol=1e-5, atol=1e-5), (out, ref)

    print("KERNEL_OK")
</pallas_src>

<mosaic_0001>
module attributes {stable_mosaic.version = 11 : i64} {
  func.func @_bce_sum_kernel(%arg0: i32, %arg1: i32, %arg2: memref<32x128xf32, #tpu.memory_space<vmem>>, %arg3: memref<32x128xf32, #tpu.memory_space<vmem>>, %arg4: memref<8x128xf32, #tpu.memory_space<vmem>>, %arg5: memref<8x128xf32, #tpu.memory_space<vmem>>) attributes {dimension_semantics = [#tpu.dimension_semantics<parallel>, #tpu.dimension_semantics<arbitrary>], iteration_bounds = array<i64: 1, 1>, scalar_prefetch = 0 : i64, scratch_operands = 1 : i64, tpu.core_type = #tpu.core_type<tc>, window_params = [{transform_indices = @transform_0, window_bounds = array<i64: 32, 128>}, {transform_indices = @transform_1, window_bounds = array<i64: 32, 128>}, {transform_indices = @transform_2, window_bounds = array<i64: 8, 128>}]} {
    %c0_i32 = arith.constant 0 : i32
    %0 = arith.cmpi eq, %arg1, %c0_i32 : i32
    %1 = arith.extui %0 : i1 to i32
    %c0_i32_0 = arith.constant 0 : i32
    %2 = arith.cmpi ne, %1, %c0_i32_0 : i32
    scf.if %2 {
      %cst = arith.constant 0.000000e+00 : f32
      %14 = vector.broadcast %cst : f32 to vector<8x128xf32>
      %c0 = arith.constant 0 : index
      %c0_7 = arith.constant 0 : index
      %15 = vector.load %arg5[%c0, %c0_7] : memref<8x128xf32, #tpu.memory_space<vmem>>, vector<8x128xf32>
      tpu.vector_store %arg5[%c0, %c0_7], %14 {strides = array<i32>} : memref<8x128xf32, #tpu.memory_space<vmem>>, vector<8x128xf32>,
    } else {
    }
    %c1_i32 = arith.constant 1 : i32
    %3 = arith.muli %arg0, %c1_i32 : i32
    %4 = arith.addi %3, %arg1 : i32
    %c0_i32_1 = arith.constant 0 : i32
    %5 = arith.cmpi slt, %4, %c0_i32_1 : i32
    %6 = arith.extui %5 : i1 to i32
    %c0_i32_2 = arith.constant 0 : i32
    %7 = arith.cmpi ne, %6, %c0_i32_2 : i32
    scf.if %7 {
      %c0 = arith.constant 0 : index
      %c0_7 = arith.constant 0 : index
      %14 = vector.load %arg2[%c0, %c0_7] : memref<32x128xf32, #tpu.memory_space<vmem>>, vector<32x128xf32>
      %c0_8 = arith.constant 0 : index
      %c0_9 = arith.constant 0 : index
      %15 = vector.load %arg3[%c0_8, %c0_9] : memref<32x128xf32, #tpu.memory_space<vmem>>, vector<32x128xf32>
      %16 = math.log %14 : vector<32x128xf32>
      %cst = arith.constant -1.000000e+02 : f32
      %17 = vector.broadcast %cst : f32 to vector<32x128xf32>
      %18 = arith.maximumf %16, %17 : vector<32x128xf32>
      %cst_10 = arith.constant 1.000000e+00 : f32
      %19 = vector.broadcast %cst_10 : f32 to vector<32x128xf32>
      %20 = arith.subf %19, %14 : vector<32x128xf32>
      %21 = math.log %20 : vector<32x128xf32>
      %cst_11 = arith.constant -1.000000e+02 : f32
      %22 = vector.broadcast %cst_11 : f32 to vector<32x128xf32>
      %23 = arith.maximumf %21, %22 : vector<32x128xf32>
      %24 = arith.subf %18, %23 : vector<32x128xf32>
      %25 = arith.mulf %15, %24 : vector<32x128xf32>
      %26 = arith.addf %23, %25 : vector<32x128xf32>
      %c0_12 = arith.constant 0 : index
      %c0_13 = arith.constant 0 : index
      %27 = vector.load %arg5[%c0_12, %c0_13] : memref<8x128xf32, #tpu.memory_space<vmem>>, vector<8x128xf32>
      %28 = vector.shape_cast %26 : vector<32x128xf32> to vector<4x8x128xf32>
      %cst_14 = arith.constant dense<0.000000e+00> : vector<8x128xf32>
      %29 = vector.multi_reduction <add>, %28, %cst_14 [0] : vector<4x8x128xf32> to vector<8x128xf32>
      %30 = arith.addf %27, %29 : vector<8x128xf32>
      %c0_15 = arith.constant 0 : index
      %c0_16 = arith.constant 0 : index
      %31 = vector.load %arg5[%c0_15, %c0_16] : memref<8x128xf32, #tpu.memory_space<vmem>>, vector<8x128xf32>
      tpu.vector_store %arg5[%c0_15, %c0_16], %30 {strides = array<i32>} : memref<8x128xf32, #tpu.memory_space<vmem>>, vector<8x128xf32>,
    } else {
    }
    %c0_i32_3 = arith.constant 0 : i32
    %8 = arith.cmpi eq, %4, %c0_i32_3 : i32
    %9 = arith.extui %8 : i1 to i32
    %c0_i32_4 = arith.constant 0 : i32
    %10 = arith.cmpi ne, %9, %c0_i32_4 : i32
    scf.if %10 {
      %c0 = arith.constant 0 : index
      %c0_7 = arith.constant 0 : index
      %14 = vector.load %arg2[%c0, %c0_7] : memref<32x128xf32, #tpu.memory_space<vmem>>, vector<32x128xf32>
      %c0_8 = arith.constant 0 : index
      %c0_9 = arith.constant 0 : index
      %15 = vector.load %arg3[%c0_8, %c0_9] : memref<32x128xf32, #tpu.memory_space<vmem>>, vector<32x128xf32>
      %16 = math.log %14 : vector<32x128xf32>
      %cst = arith.constant -1.000000e+02 : f32
      %17 = vector.broadcast %cst : f32 to vector<32x128xf32>
      %18 = arith.maximumf %16, %17 : vector<32x128xf32>
      %cst_10 = arith.constant 1.000000e+00 : f32
      %19 = vector.broadcast %cst_10 : f32 to vector<32x128xf32>
      %20 = arith.subf %19, %14 : vector<32x128xf32>
      %21 = math.log %20 : vector<32x128xf32>
      %cst_11 = arith.constant -1.000000e+02 : f32
      %22 = vector.broadcast %cst_11 : f32 to vector<32x128xf32>
      %23 = arith.maximumf %21, %22 : vector<32x128xf32>
      %24 = arith.subf %18, %23 : vector<32x128xf32>
      %25 = arith.mulf %15, %24 : vector<32x128xf32>
      %26 = arith.addf %23, %25 : vector<32x128xf32>
      %c32_i32 = arith.constant 32 : i32
      %27 = arith.muli %4, %c32_i32 : i32
      %28 = tpu.iota {dimensions = array<i32: 0>} : vector<32x128xi32>
      %29 = vector.broadcast %27 : i32 to vector<32x128xi32>
      %30 = arith.addi %29, %28 : vector<32x128xi32>
      %c16_i32 = arith.constant 16 : i32
      %31 = vector.broadcast %c16_i32 : i32 to vector<32x128xi32>
      %32 = arith.cmpi slt, %30, %31 : vector<32x128xi32>
      %cst_12 = arith.constant 0.000000e+00 : f32
      %33 = vector.broadcast %cst_12 : f32 to vector<32x128xf32>
      %34 = arith.select %32, %26, %33 : vector<32x128xi1>, vector<32x128xf32>
      %c0_13 = arith.constant 0 : index
      %c0_14 = arith.constant 0 : index
      %35 = vector.load %arg5[%c0_13, %c0_14] : memref<8x128xf32, #tpu.memory_space<vmem>>, vector<8x128xf32>
      %36 = vector.shape_cast %34 : vector<32x128xf32> to vector<4x8x128xf32>
      %cst_15 = arith.constant dense<0.000000e+00> : vector<8x128xf32>
      %37 = vector.multi_reduction <add>, %36, %cst_15 [0] : vector<4x8x128xf32> to vector<8x128xf32>
      %38 = arith.addf %35, %37 : vector<8x128xf32>
      %c0_16 = arith.constant 0 : index
      %c0_17 = arith.constant 0 : index
      %39 = vector.load %arg5[%c0_16, %c0_17] : memref<8x128xf32, #tpu.memory_space<vmem>>, vector<8x128xf32>
      tpu.vector_store %arg5[%c0_16, %c0_17], %38 {strides = array<i32>} : memref<8x128xf32, #tpu.memory_space<vmem>>, vector<8x128xf32>,
    } else {
    }
    %c0_i32_5 = arith.constant 0 : i32
    %11 = arith.cmpi eq, %arg1, %c0_i32_5 : i32
    %12 = arith.extui %11 : i1 to i32
    %c0_i32_6 = arith.constant 0 : i32
    %13 = arith.cmpi ne, %12, %c0_i32_6 : i32
    scf.if %13 {
      %c0 = arith.constant 0 : index
      %c0_7 = arith.constant 0 : index
      %14 = vector.load %arg5[%c0, %c0_7] : memref<8x128xf32, #tpu.memory_space<vmem>>, vector<8x128xf32>
      %c0_8 = arith.constant 0 : index
      %c0_9 = arith.constant 0 : index
      %15 = vector.load %arg4[%c0_8, %c0_9] : memref<8x128xf32, #tpu.memory_space<vmem>>, vector<8x128xf32>
      tpu.vector_store %arg4[%c0_8, %c0_9], %14 {strides = array<i32>} : memref<8x128xf32, #tpu.memory_space<vmem>>, vector<8x128xf32>,
    } else {
    }
    return
  }
  func.func @transform_0(%arg0: i32, %arg1: i32) -> (i32, i32) {
    %c1_i32 = arith.constant 1 : i32
    %0 = arith.muli %arg0, %c1_i32 : i32
    %1 = arith.addi %0, %arg1 : i32
    %c0_i32 = arith.constant 0 : i32
    %2 = arith.minsi %1, %c0_i32 : i32
    %c0_i32_0 = arith.constant 0 : i32
    %c0_i32_1 = arith.constant 0 : i32
    return %2, %c0_i32_0 : i32, i32
  }
  func.func @transform_1(%arg0: i32, %arg1: i32) -> (i32, i32) {
    %c1_i32 = arith.constant 1 : i32
    %0 = arith.muli %arg0, %c1_i32 : i32
    %1 = arith.addi %0, %arg1 : i32
    %c0_i32 = arith.constant 0 : i32
    %2 = arith.minsi %1, %c0_i32 : i32
    %c0_i32_0 = arith.constant 0 : i32
    %c0_i32_1 = arith.constant 0 : i32
    return %2, %c0_i32_0 : i32, i32
  }
  func.func @transform_2(%arg0: i32, %arg1: i32) -> (i32, i32) {
    %c0_i32 = arith.constant 0 : i32
    %c0_i32_0 = arith.constant 0 : i32
    return %arg0, %c0_i32 : i32, i32
  }
}

</mosaic_0001>

<bundles_post_ra>
// kernel: _multi_bce_loss_impl.1
= control target key start
LH: loop header
LB: loop body
LE: loop exit
PB: predicated region body
PF: predicated region fallthrough
CT: control target
= control target key end

     0   :  { %s295_s0 = inlined_call_operand.vmem [shape: f32[16,128], index: 0, kind: input, shape index: {}]   ;;  %s296_s1 = inlined_call_operand.vmem [shape: f32[16,128], index: 1, kind: input, shape index: {}]   ;;  %s297_s2 = inlined_call_operand.vmem [shape: f32[8,128], index: 2, kind: output, shape index: {}]  }
   0x1   :  { %v163_v0 = vld [vmem:[%s295_s0] sm:$0xff]  ;;  %v164_v1 = vld [vmem:[%s295_s0 + $0x8] sm:$0xff] }
   0x2   :  { %257 = vlog2.f32 %v163_v0  ;;  %v183_v2 = vsub.f32 1.0, %v163_v0  ;;  %v184_v3 = vsub.f32 1.0, %v164_v1  ;;  %v167_v15 = vld [vmem:[%s296_s1] sm:$0xff]  ;;  %v168_v17 = vld [vmem:[%s296_s1 + $0x8] sm:$0xff] }
   0x3   :  { %259 = vlog2.f32 %v164_v1 }
   0x4   :  { %261 = vlog2.f32 %v183_v2 }
   0x5   :  { %263 = vlog2.f32 %v184_v3 }
   0xc   :  { %v258_v4 = vpop.eup %257 }
   0xd   :  { %v260_v5 = vpop.eup %259  ;;  %v172_v6 = vmul.f32 0.6931472, %v258_v4 }
   0xe   :  { %v262_v7 = vpop.eup %261  ;;  %v174_v8 = vmul.f32 0.6931472, %v260_v5 }
   0xf   :  { %v264_v9 = vpop.eup %263  ;;  %v179_v10 = vmax.f32 %v172_v6, -100.0  ;;  %v188_v11 = vmul.f32 0.6931472, %v262_v7 }
  0x10   :  { %v180_v12 = vmax.f32 %v174_v8, -100.0  ;;  %v190_v13 = vmul.f32 0.6931472, %v264_v9 }
  0x11   :  { %v195_v14 = vmax.f32 %v188_v11, -100.0 }
  0x12   :  { %v196_v16 = vmax.f32 %v190_v13, -100.0 }
  0x13   :  { %v199_v18 = vsub.f32 %v179_v10, %v195_v14 }
  0x14   :  { %v200_v19 = vsub.f32 %v180_v12, %v196_v16 }
  0x15   :  { %v203_v20 = vmul.f32 %v199_v18, %v167_v15 }
  0x16   :  { %v204_v21 = vmul.f32 %v200_v19, %v168_v17 }
  0x17   :  { %v207_v22 = vadd.f32 %v203_v20, %v195_v14 }
  0x18   :  { %v208_v23 = vadd.f32 %v204_v21, %v196_v16 }
  0x1a   :  { %v231_v24 = vadd.f32 %v208_v23, %v207_v22 }
  0x1c   :  { %240 = vst [vmem:[%s297_s2] sm:$0xff] %v231_v24 }

</bundles_post_ra>
